<compile_context>
chip_gen: v7x
topology: tpu7x:2x2x1
jax: 0.10.0
libtpu: 0.0.40
codegen_flags: <defaults>
</compile_context>

<pallas_src>
import jax
import jax.numpy as jnp
from jax.experimental import pallas as pl
from jax.experimental.pallas import tpu as pltpu

EPS = 1e-8


def _prlstm_kernel(x_ref, hx_ref, xlen_ref, hlen_ref, cx_ref,
                   wih_ref, whh_ref, wlih_ref, wlhh_ref, b_ref,
                   hy_ref, cy_ref):
    """One hidden tile of the PRLSTM cell forward.

    x_ref    : (B, In)      resident input (matmul dtype)
    hx_ref   : (B, H)       resident hidden state (matmul dtype)
    xlen_ref : (B, 1)  f32  precomputed ||x rows||   (clamped at eps)
    hlen_ref : (B, 1)  f32  precomputed ||hx rows||  (clamped at eps)
    cx_ref   : (B, th) f32  cell-state tile
    wih_ref  : (In, 4*th)   Wih^T tile, gate-regrouped columns
    whh_ref  : (H, 4*th)    Whh^T tile, gate-regrouped columns
    wlih_ref : (1, 4*th) f32  ||Wih rows|| for this tile
    wlhh_ref : (1, 4*th) f32  ||Whh rows|| for this tile
    b_ref    : (1, 4*th) f32  b_ih + b_hh for this tile
    """
    th = cx_ref.shape[1]

    # Two MXU matmuls against the K-contiguous weight slices of this gate tile.
    prod_ih = jnp.dot(x_ref[...], wih_ref[...], preferred_element_type=jnp.float32)
    prod_hh = jnp.dot(hx_ref[...], whh_ref[...], preferred_element_type=jnp.float32)

    # PRLinear forward == symmetric clamp of the plain pre-activation:
    #   wx_len*(|sin|*cos + cos*(1-|sin|)) == wx_len*cos == clip(x@W^T, +-wx_len)
    bound_ih = jnp.maximum(xlen_ref[...] * wlih_ref[...], EPS)
    bound_hh = jnp.maximum(hlen_ref[...] * wlhh_ref[...], EPS)
    gates = (jnp.clip(prod_ih, -bound_ih, bound_ih)
             + jnp.clip(prod_hh, -bound_hh, bound_hh)
             + b_ref[...])

    ingate = jax.nn.sigmoid(gates[:, 0 * th:1 * th])
    forgetgate = jax.nn.sigmoid(gates[:, 1 * th:2 * th])
    cellgate = jnp.tanh(gates[:, 2 * th:3 * th])
    outgate = jax.nn.sigmoid(gates[:, 3 * th:4 * th])

    cy = forgetgate * cx_ref[...] + ingate * cellgate
    cy_ref[...] = cy
    hy_ref[...] = outgate * jnp.tanh(cy)


def _vmem_capacity_bytes():
    """Physical VMEM of the current TPU generation (conservative fallback)."""
    try:
        info = pltpu.get_tpu_info()
        cap = int(getattr(info, "vmem_capacity_bytes", 0))
        if cap > 0:
            return cap
    except Exception:
        pass
    return 64 * 1024 * 1024  # v7x per-TensorCore VMEM (smallest current gen)


def _tile_plan(batch, in_features, hidden, weight_bytes, act_bytes):
    """VMEM-aware hidden-tile width + vmem limit derived from the block sizes."""
    cap = _vmem_capacity_bytes()
    budget = int(cap * 0.6)  # headroom for compiler scratch / pipelining

    def working_set(th):
        w = 2 * (in_features + hidden) * 4 * th * weight_bytes       # Wih^T + Whh^T tiles (double-buffered)
        resident = 2 * batch * (in_features + hidden) * act_bytes    # x + hx
        resident += 2 * 2 * batch * 4                                # x_len + h_len
        small = 2 * 3 * 4 * th * 4                                   # wlen_ih, wlen_hh, bias tiles
        state = 2 * 3 * batch * th * 4                               # cx, hy, cy tiles
        return w + resident + small + state

    if hidden % 128 == 0:
        cands = [d for d in range(hidden, 0, -128) if hidden % d == 0]
    else:
        cands = [hidden]  # small / unaligned H: one full-width tile (block == array dims)

    fitting = [t for t in cands if working_set(t) <= budget]
    if not fitting:
        # TODO(synk): K-reduction grid axis needed here; fall back to the
        # narrowest tile (may spill / exceed the limit for extreme In+H).
        th = cands[-1]
    elif hidden >= 256:
        multi = [t for t in fitting if hidden // t >= 2]  # >=2 tiles -> v7x megacore
        th = multi[0] if multi else fitting[0]
    else:
        th = fitting[0]

    vmem_limit = int(min(cap * 0.9, max(working_set(th) * 1.5, 32 * 1024 * 1024)))
    return th, vmem_limit


def _regroup_gates(a, H, th):
    """Reorder last dim from [i|f|g|o] (each width H) into per-hidden-tile groups
    [i_t|f_t|g_t|o_t] of width 4*th, so the grid over hidden tiles sees
    lane-dense, tile-aligned gate blocks."""
    nt = H // th
    if nt == 1:
        return a
    lead = a.shape[:-1]
    a = a.reshape(lead + (4, nt, th))
    a = jnp.swapaxes(a, -3, -2)          # (..., nt, 4, th)
    return a.reshape(lead + (4 * H,))


def prlstm_cell(x, hidden, w_ih, w_hh, b_ih, b_hh, *, matmul_dtype=None):
    """PRLSTMCell forward.

    x: (B, In); hidden = (hx, cx) each (B, H)
    w_ih: (4H, In), w_hh: (4H, H), b_ih/b_hh: (4H,)  (PyTorch conventions)
    matmul_dtype: optional dtype for the MXU operands (e.g. jnp.bfloat16 — the
      recommended default for bandwidth-bound large-H inference, especially on
      v5e); accumulation and all elementwise math stay in f32.
    Returns (hy, cy).
    """
    hx, cx = hidden
    B, H = hx.shape
    In = x.shape[1]

    f32 = jnp.float32
    x = jnp.asarray(x, f32)
    hx = jnp.asarray(hx, f32)
    cx = jnp.asarray(cx, f32)
    w_ih = jnp.asarray(w_ih, f32)
    w_hh = jnp.asarray(w_hh, f32)
    b_ih = jnp.asarray(b_ih, f32)
    b_hh = jnp.asarray(b_hh, f32)

    mm_dtype = f32 if matmul_dtype is None else jnp.dtype(matmul_dtype)
    mm_bytes = jnp.dtype(mm_dtype).itemsize
    th, vmem_limit = _tile_plan(B, In, H, mm_bytes, mm_bytes)
    nt = H // th

    # ---- loop-invariant parameter prep (in a real sequence loop, hoist/cache
    #      this once per sequence instead of once per step) ---------------------
    w_ih_t = _regroup_gates(w_ih.T, H, th).astype(mm_dtype)        # (In, 4H)
    w_hh_t = _regroup_gates(w_hh.T, H, th).astype(mm_dtype)        # (H, 4H)
    wlen_ih = _regroup_gates(
        jnp.sqrt(jnp.maximum(jnp.sum(w_ih * w_ih, axis=1), EPS))[None, :], H, th)  # (1, 4H)
    wlen_hh = _regroup_gates(
        jnp.sqrt(jnp.maximum(jnp.sum(w_hh * w_hh, axis=1), EPS))[None, :], H, th)  # (1, 4H)
    bias = _regroup_gates((b_ih + b_hh)[None, :], H, th)                            # (1, 4H)

    # ---- per-step input prep: row norms once (f32), MXU-operand cast once -----
    x_len = jnp.sqrt(jnp.maximum(jnp.sum(x * x, axis=1, keepdims=True), EPS))       # (B, 1)
    h_len = jnp.sqrt(jnp.maximum(jnp.sum(hx * hx, axis=1, keepdims=True), EPS))     # (B, 1)
    x_mm = x.astype(mm_dtype)
    hx_mm = hx.astype(mm_dtype)

    hy, cy = pl.pallas_call(
        _prlstm_kernel,
        out_shape=(
            jax.ShapeDtypeStruct((B, H), f32),
            jax.ShapeDtypeStruct((B, H), f32),
        ),
        grid=(nt,),
        in_specs=[
            pl.BlockSpec((B, In), lambda t: (0, 0)),         # x (resident)
            pl.BlockSpec((B, H), lambda t: (0, 0)),          # hx (resident)
            pl.BlockSpec((B, 1), lambda t: (0, 0)),          # ||x rows||
            pl.BlockSpec((B, 1), lambda t: (0, 0)),          # ||hx rows||
            pl.BlockSpec((B, th), lambda t: (0, t)),         # cx tile
            pl.BlockSpec((In, 4 * th), lambda t: (0, t)),    # Wih^T tile
            pl.BlockSpec((H, 4 * th), lambda t: (0, t)),     # Whh^T tile
            pl.BlockSpec((1, 4 * th), lambda t: (0, t)),     # ||Wih rows|| tile
            pl.BlockSpec((1, 4 * th), lambda t: (0, t)),     # ||Whh rows|| tile
            pl.BlockSpec((1, 4 * th), lambda t: (0, t)),     # b_ih + b_hh tile
        ],
        out_specs=(
            pl.BlockSpec((B, th), lambda t: (0, t)),
            pl.BlockSpec((B, th), lambda t: (0, t)),
        ),
        compiler_params=pltpu.CompilerParams(
            dimension_semantics=("parallel",),               # megacore sharding on v7x
            vmem_limit_bytes=vmem_limit,
        ),
    )(x_mm, hx_mm, x_len, h_len, cx, w_ih_t, w_hh_t, wlen_ih, wlen_hh, bias)
    return hy, cy


def _reference(x, hidden, w_ih, w_hh, b_ih, b_hh):
    """Pure-JAX reference of the original PyTorch forward (full PR formulation)."""
    hx, cx = hidden

    def pr_linear(x, w, b):
        w_len = jnp.sqrt(jnp.maximum(jnp.sum(w * w, axis=1, keepdims=True), EPS)).T
        x_len = jnp.sqrt(jnp.maximum(jnp.sum(x * x, axis=1, keepdims=True), EPS))
        wx_len = jnp.maximum(x_len @ w_len, EPS)
        cos = jnp.clip((x @ w.T) / wx_len, -1.0, 1.0)
        s = jnp.sqrt(1.0 - cos ** 2)
        return wx_len * (s * cos + cos * (1.0 - s)) + b

    gates = pr_linear(x, w_ih, b_ih) + pr_linear(hx, w_hh, b_hh)
    H = hx.shape[1]
    i = jax.nn.sigmoid(gates[:, :H])
    f = jax.nn.sigmoid(gates[:, H:2 * H])
    g = jnp.tanh(gates[:, 2 * H:3 * H])
    o = jax.nn.sigmoid(gates[:, 3 * H:])
    cy = f * cx + i * g
    hy = o * jnp.tanh(cy)
    return hy, cy


if __name__ == "__main__":
    input_size = 16
    hidden_size = 32
    batch = 2

    key = jax.random.PRNGKey(0)
    k_x, k_h, k_c, k_wih, k_whh, k_bih, k_bhh = jax.random.split(key, 7)

    bound_ih = 1.0 / (input_size ** 0.5)
    bound_hh = 1.0 / (hidden_size ** 0.5)
    w_ih = jax.random.uniform(k_wih, (4 * hidden_size, input_size),
                              minval=-bound_ih, maxval=bound_ih, dtype=jnp.float32)
    b_ih = jax.random.uniform(k_bih, (4 * hidden_size,),
                              minval=-bound_ih, maxval=bound_ih, dtype=jnp.float32)
    w_hh = jax.random.uniform(k_whh, (4 * hidden_size, hidden_size),
                              minval=-bound_hh, maxval=bound_hh, dtype=jnp.float32)
    b_hh = jax.random.uniform(k_bhh, (4 * hidden_size,),
                              minval=-bound_hh, maxval=bound_hh, dtype=jnp.float32)

    x = jax.random.normal(k_x, (batch, input_size), dtype=jnp.float32)
    hx = jax.random.normal(k_h, (batch, hidden_size), dtype=jnp.float32)
    cx = jax.random.normal(k_c, (batch, hidden_size), dtype=jnp.float32)

    # f32 path: strict check against the full PR reference.
    hy, cy = prlstm_cell(x, (hx, cx), w_ih, w_hh, b_ih, b_hh)
    jax.block_until_ready((hy, cy))

    hy_ref, cy_ref = _reference(x, (hx, cx), w_ih, w_hh, b_ih, b_hh)
    assert jnp.allclose(hy, hy_ref, atol=1e-5, rtol=1e-5)
    assert jnp.allclose(cy, cy_ref, atol=1e-5, rtol=1e-5)

    # bf16 MXU-operand path (halves weight VMEM/HBM traffic at large H): loose
    # check — the clamp bound stays f32 so it is applied to a slightly different
    # pre-activation than the bf16 matmul result.
    hy_bf, cy_bf = prlstm_cell(x, (hx, cx), w_ih, w_hh, b_ih, b_hh,
                               matmul_dtype=jnp.bfloat16)
    jax.block_until_ready((hy_bf, cy_bf))
    assert float(jnp.max(jnp.abs(hy_bf - hy_ref))) < 0.1
    assert float(jnp.max(jnp.abs(cy_bf - cy_ref))) < 0.1

    print("KERNEL_OK")
</pallas_src>

<mosaic_0001>
module attributes {stable_mosaic.version = 11 : i64} {
  func.func @_prlstm_kernel(%arg0: i32, %arg1: memref<2x16xf32, #tpu.memory_space<vmem>>, %arg2: memref<2x32xf32, #tpu.memory_space<vmem>>, %arg3: memref<2x1xf32, #tpu.memory_space<vmem>>, %arg4: memref<2x1xf32, #tpu.memory_space<vmem>>, %arg5: memref<2x32xf32, #tpu.memory_space<vmem>>, %arg6: memref<16x128xf32, #tpu.memory_space<vmem>>, %arg7: memref<32x128xf32, #tpu.memory_space<vmem>>, %arg8: memref<1x128xf32, #tpu.memory_space<vmem>>, %arg9: memref<1x128xf32, #tpu.memory_space<vmem>>, %arg10: memref<1x128xf32, #tpu.memory_space<vmem>>, %arg11: memref<2x32xf32, #tpu.memory_space<vmem>>, %arg12: memref<2x32xf32, #tpu.memory_space<vmem>>) attributes {dimension_semantics = [#tpu.dimension_semantics<parallel>], iteration_bounds = array<i64: 1>, scalar_prefetch = 0 : i64, scratch_operands = 0 : i64, tpu.core_type = #tpu.core_type<tc>, window_params = [{pipeline_mode = #tpu.pipeline_mode<synchronous>, transform_indices = @transform_0, window_bounds = array<i64: 2, 16>}, {pipeline_mode = #tpu.pipeline_mode<synchronous>, transform_indices = @transform_1, window_bounds = array<i64: 2, 32>}, {pipeline_mode = #tpu.pipeline_mode<synchronous>, transform_indices = @transform_2, window_bounds = array<i64: 2, 1>}, {pipeline_mode = #tpu.pipeline_mode<synchronous>, transform_indices = @transform_3, window_bounds = array<i64: 2, 1>}, {transform_indices = @transform_4, window_bounds = array<i64: 2, 32>}, {transform_indices = @transform_5, window_bounds = array<i64: 16, 128>}, {transform_indices = @transform_6, window_bounds = array<i64: 32, 128>}, {transform_indices = @transform_7, window_bounds = array<i64: 1, 128>}, {transform_indices = @transform_8, window_bounds = array<i64: 1, 128>}, {transform_indices = @transform_9, window_bounds = array<i64: 1, 128>}, {transform_indices = @transform_10, window_bounds = array<i64: 2, 32>}, {transform_indices = @transform_11, window_bounds = array<i64: 2, 32>}]} {
    %c0 = arith.constant 0 : index
    %c0_0 = arith.constant 0 : index
    %0 = vector.load %arg1[%c0, %c0_0] : memref<2x16xf32, #tpu.memory_space<vmem>>, vector<2x16xf32>
    %c0_1 = arith.constant 0 : index
    %c0_2 = arith.constant 0 : index
    %1 = vector.load %arg6[%c0_1, %c0_2] : memref<16x128xf32, #tpu.memory_space<vmem>>, vector<16x128xf32>
    %cst = arith.constant dense<0.000000e+00> : vector<2x128xf32>
    %2 = tpu.matmul %0, %1, %cst {dimension_numbers = #tpu.dot_dimension_numbers<[1], [0], [0], [1], [0, 0, 1, 1], [], []>} : vector<2x16xf32>, vector<16x128xf32>, vector<2x128xf32> -> vector<2x128xf32>
    %c0_3 = arith.constant 0 : index
    %c0_4 = arith.constant 0 : index
    %3 = vector.load %arg2[%c0_3, %c0_4] : memref<2x32xf32, #tpu.memory_space<vmem>>, vector<2x32xf32>
    %c0_5 = arith.constant 0 : index
    %c0_6 = arith.constant 0 : index
    %4 = vector.load %arg7[%c0_5, %c0_6] : memref<32x128xf32, #tpu.memory_space<vmem>>, vector<32x128xf32>
    %cst_7 = arith.constant dense<0.000000e+00> : vector<2x128xf32>
    %5 = tpu.matmul %3, %4, %cst_7 {dimension_numbers = #tpu.dot_dimension_numbers<[1], [0], [0], [1], [0, 0, 1, 1], [], []>} : vector<2x32xf32>, vector<32x128xf32>, vector<2x128xf32> -> vector<2x128xf32>
    %c0_8 = arith.constant 0 : index
    %c0_9 = arith.constant 0 : index
    %6 = vector.load %arg3[%c0_8, %c0_9] : memref<2x1xf32, #tpu.memory_space<vmem>>, vector<2x1xf32>
    %c0_10 = arith.constant 0 : index
    %c0_11 = arith.constant 0 : index
    %7 = vector.load %arg8[%c0_10, %c0_11] : memref<1x128xf32, #tpu.memory_space<vmem>>, vector<1x128xf32>
    %8 = vector.broadcast %6 : vector<2x1xf32> to vector<2x128xf32>
    %9 = vector.broadcast %7 : vector<1x128xf32> to vector<2x128xf32>
    %10 = arith.mulf %8, %9 : vector<2x128xf32>
    %cst_12 = arith.constant 9.99999993E-9 : f32
    %11 = vector.broadcast %cst_12 : f32 to vector<2x128xf32>
    %12 = arith.maximumf %10, %11 : vector<2x128xf32>
    %c0_13 = arith.constant 0 : index
    %c0_14 = arith.constant 0 : index
    %13 = vector.load %arg4[%c0_13, %c0_14] : memref<2x1xf32, #tpu.memory_space<vmem>>, vector<2x1xf32>
    %c0_15 = arith.constant 0 : index
    %c0_16 = arith.constant 0 : index
    %14 = vector.load %arg9[%c0_15, %c0_16] : memref<1x128xf32, #tpu.memory_space<vmem>>, vector<1x128xf32>
    %15 = vector.broadcast %13 : vector<2x1xf32> to vector<2x128xf32>
    %16 = vector.broadcast %14 : vector<1x128xf32> to vector<2x128xf32>
    %17 = arith.mulf %15, %16 : vector<2x128xf32>
    %cst_17 = arith.constant 9.99999993E-9 : f32
    %18 = vector.broadcast %cst_17 : f32 to vector<2x128xf32>
    %19 = arith.maximumf %17, %18 : vector<2x128xf32>
    %cst_18 = arith.constant 0.000000e+00 : f32
    %20 = vector.broadcast %cst_18 : f32 to vector<2x128xf32>
    %21 = arith.subf %20, %12 : vector<2x128xf32>
    %22 = arith.maximumf %21, %2 : vector<2x128xf32>
    %23 = arith.minimumf %12, %22 : vector<2x128xf32>
    %cst_19 = arith.constant 0.000000e+00 : f32
    %24 = vector.broadcast %cst_19 : f32 to vector<2x128xf32>
    %25 = arith.subf %24, %19 : vector<2x128xf32>
    %26 = arith.maximumf %25, %5 : vector<2x128xf32>
    %27 = arith.minimumf %19, %26 : vector<2x128xf32>
    %28 = arith.addf %23, %27 : vector<2x128xf32>
    %c0_20 = arith.constant 0 : index
    %c0_21 = arith.constant 0 : index
    %29 = vector.load %arg10[%c0_20, %c0_21] : memref<1x128xf32, #tpu.memory_space<vmem>>, vector<1x128xf32>
    %30 = vector.broadcast %29 : vector<1x128xf32> to vector<2x128xf32>
    %31 = arith.addf %28, %30 : vector<2x128xf32>
    %32 = vector.extract_strided_slice %31 {offsets = [0, 0], sizes = [2, 32], strides = [1, 1]} : vector<2x128xf32> to vector<2x32xf32>
    %33 = arith.negf %32 : vector<2x32xf32>
    %34 = math.exp %33 : vector<2x32xf32>
    %cst_22 = arith.constant 1.000000e+00 : f32
    %35 = vector.broadcast %cst_22 : f32 to vector<2x32xf32>
    %36 = arith.addf %35, %34 : vector<2x32xf32>
    %37 = arith.divf %35, %36 : vector<2x32xf32>
    %38 = vector.extract_strided_slice %31 {offsets = [0, 32], sizes = [2, 32], strides = [1, 1]} : vector<2x128xf32> to vector<2x32xf32>
    %39 = arith.negf %38 : vector<2x32xf32>
    %40 = math.exp %39 : vector<2x32xf32>
    %cst_23 = arith.constant 1.000000e+00 : f32
    %41 = vector.broadcast %cst_23 : f32 to vector<2x32xf32>
    %42 = arith.addf %41, %40 : vector<2x32xf32>
    %43 = arith.divf %41, %42 : vector<2x32xf32>
    %44 = vector.extract_strided_slice %31 {offsets = [0, 64], sizes = [2, 32], strides = [1, 1]} : vector<2x128xf32> to vector<2x32xf32>
    %45 = math.tanh %44 : vector<2x32xf32>
    %46 = vector.extract_strided_slice %31 {offsets = [0, 96], sizes = [2, 32], strides = [1, 1]} : vector<2x128xf32> to vector<2x32xf32>
    %47 = arith.negf %46 : vector<2x32xf32>
    %48 = math.exp %47 : vector<2x32xf32>
    %cst_24 = arith.constant 1.000000e+00 : f32
    %49 = vector.broadcast %cst_24 : f32 to vector<2x32xf32>
    %50 = arith.addf %49, %48 : vector<2x32xf32>
    %51 = arith.divf %49, %50 : vector<2x32xf32>
    %c0_25 = arith.constant 0 : index
    %c0_26 = arith.constant 0 : index
    %52 = vector.load %arg5[%c0_25, %c0_26] : memref<2x32xf32, #tpu.memory_space<vmem>>, vector<2x32xf32>
    %53 = arith.mulf %43, %52 : vector<2x32xf32>
    %54 = arith.mulf %37, %45 : vector<2x32xf32>
    %55 = arith.addf %53, %54 : vector<2x32xf32>
    %c0_27 = arith.constant 0 : index
    %c0_28 = arith.constant 0 : index
    %56 = vector.load %arg12[%c0_27, %c0_28] : memref<2x32xf32, #tpu.memory_space<vmem>>, vector<2x32xf32>
    tpu.vector_store %arg12[%c0_27, %c0_28], %55 {strides = array<i32>} : memref<2x32xf32, #tpu.memory_space<vmem>>, vector<2x32xf32>,
    %57 = math.tanh %55 : vector<2x32xf32>
    %58 = arith.mulf %51, %57 : vector<2x32xf32>
    %c0_29 = arith.constant 0 : index
    %c0_30 = arith.constant 0 : index
    %59 = vector.load %arg11[%c0_29, %c0_30] : memref<2x32xf32, #tpu.memory_space<vmem>>, vector<2x32xf32>
    tpu.vector_store %arg11[%c0_29, %c0_30], %58 {strides = array<i32>} : memref<2x32xf32, #tpu.memory_space<vmem>>, vector<2x32xf32>,
    return
  }
  func.func @transform_0(%arg0: i32) -> (i32, i32) {
    %c0_i32 = arith.constant 0 : i32
    %c0_i32_0 = arith.constant 0 : i32
    %c0_i32_1 = arith.constant 0 : i32
    return %c0_i32, %c0_i32_0 : i32, i32
  }
  func.func @transform_1(%arg0: i32) -> (i32, i32) {
    %c0_i32 = arith.constant 0 : i32
    %c0_i32_0 = arith.constant 0 : i32
    %c0_i32_1 = arith.constant 0 : i32
    return %c0_i32, %c0_i32_0 : i32, i32
  }
  func.func @transform_2(%arg0: i32) -> (i32, i32) {
    %c0_i32 = arith.constant 0 : i32
    %c0_i32_0 = arith.constant 0 : i32
    %c0_i32_1 = arith.constant 0 : i32
    return %c0_i32, %c0_i32_0 : i32, i32
  }
  func.func @transform_3(%arg0: i32) -> (i32, i32) {
    %c0_i32 = arith.constant 0 : i32
    %c0_i32_0 = arith.constant 0 : i32
    %c0_i32_1 = arith.constant 0 : i32
    return %c0_i32, %c0_i32_0 : i32, i32
  }
  func.func @transform_4(%arg0: i32) -> (i32, i32) {
    %c0_i32 = arith.constant 0 : i32
    %c0_i32_0 = arith.constant 0 : i32
    return %c0_i32, %arg0 : i32, i32
  }
  func.func @transform_5(%arg0: i32) -> (i32, i32) {
    %c0_i32 = arith.constant 0 : i32
    %c0_i32_0 = arith.constant 0 : i32
    return %c0_i32, %arg0 : i32, i32
  }
  func.func @transform_6(%arg0: i32) -> (i32, i32) {
    %c0_i32 = arith.constant 0 : i32
    %c0_i32_0 = arith.constant 0 : i32
    return %c0_i32, %arg0 : i32, i32
  }
  func.func @transform_7(%arg0: i32) -> (i32, i32) {
    %c0_i32 = arith.constant 0 : i32
    %c0_i32_0 = arith.constant 0 : i32
    return %c0_i32, %arg0 : i32, i32
  }
  func.func @transform_8(%arg0: i32) -> (i32, i32) {
    %c0_i32 = arith.constant 0 : i32
    %c0_i32_0 = arith.constant 0 : i32
    return %c0_i32, %arg0 : i32, i32
  }
  func.func @transform_9(%arg0: i32) -> (i32, i32) {
    %c0_i32 = arith.constant 0 : i32
    %c0_i32_0 = arith.constant 0 : i32
    return %c0_i32, %arg0 : i32, i32
  }
  func.func @transform_10(%arg0: i32) -> (i32, i32) {
    %c0_i32 = arith.constant 0 : i32
    %c0_i32_0 = arith.constant 0 : i32
    return %c0_i32, %arg0 : i32, i32
  }
  func.func @transform_11(%arg0: i32) -> (i32, i32) {
    %c0_i32 = arith.constant 0 : i32
    %c0_i32_0 = arith.constant 0 : i32
    return %c0_i32, %arg0 : i32, i32
  }
}

</mosaic_0001>

<bundles_post_ra>
// kernel: tpu_custom_call.1
= control target key start
LH: loop header
LB: loop body
LE: loop exit
PB: predicated region body
PF: predicated region fallthrough
CT: control target
= control target key end

     0   :  { %17 = vsyncpa [#allocation3], 0  ;;  %s600_s0 = inlined_call_operand.vmem [shape: f32[2,16], index: 0, kind: input, shape index: {}]   ;;  %s601_s1 = inlined_call_operand.vmem [shape: f32[2,32], index: 1, kind: input, shape index: {}]   ;;  %s602_s2 = inlined_call_operand.vmem [shape: f32[2,1], index: 2, kind: input, shape index: {}]   ;;  %s603_s3 = inlined_call_operand.vmem [shape: f32[2,1], index: 3, kind: input, shape index: {}]   ;;  %s604_s4 = inlined_call_operand.vmem [shape: f32[2,32], index: 4, kind: input, shape index: {}]   ;;  %s605_s5 = inlined_call_operand.vmem [shape: f32[16,128], index: 5, kind: input, shape index: {}]   ;;  %s606_s6 = inlined_call_operand.hbm [shape: f32[32,128], index: 6, kind: input, shape index: {}]   ;;  %s607_s7 = inlined_call_operand.vmem [shape: f32[1,128], index: 7, kind: input, shape index: {}]   ;;  %s608_s8 = inlined_call_operand.vmem [shape: f32[1,128], index: 8, kind: input, shape index: {}]   ;;  %s609_s9 = inlined_call_operand.vmem [shape: f32[1,128], index: 9, kind: input, shape index: {}]   ;;  %s610_s10 = inlined_call_operand.hbm [shape: f32[2,32], index: 10, kind: output, shape index: {0}]   ;;  %s611_s11 = inlined_call_operand.hbm [shape: f32[2,32], index: 11, kind: output, shape index: {1}]  }
   0x1   :  { %18 = vsyncpa [#allocation4], 0 }
   0x2   :  { %19 = vsyncpa [#allocation7], 0  ;;  %s457_s17 = smov [#allocation2]   ;;  %s385_s21 = scalar_lea.hbm %s606_s6, 512 }
   0x3   :  { %s37_s18 = sshll.u32 %s457_s17, 4  ;;  %p386_p0 = scmp.ne.s32.totalorder %s606_s6, %s385_s21  ;;  %s38_s18 = int_to_ptr.vmem [resolvable:$true] %s37_s18 }
   0x4   :  { %p389_p1 = scmp.lt.u32.totalorder %s385_s21, %s606_s6 }
   0x6   :  { %p391_p2 = pnand %p389_p1, %p386_p0 }
   0x8   :  { %394 = shalt.err (!%p391_p2)
}
   0x9   :  { %s395_s26 = scalar_lea.vmem %s38_s18, 512  ;;  %p400_p4 = scmp.lt.s32.totalorder %s38_s18, %s38_s18 }
   0xa   :  { %p396_p3 = scmp.ne.s32.totalorder %s38_s18, %s395_s26  ;;  %p401_p5 = scmp.lt.s32.totalorder %s395_s26, %s395_s26 }
   0xc   :  { %p402_p6 = por %p401_p5, %p400_p4 }
   0xe   :  { %p403_p7 = pnand %p402_p6, %p396_p3 }
  0x10   :  { %406 = shalt.err (!%p403_p7)
}
  0x11   :  { %s458_s27 = smov 128   ;;  %s459_s28 = smov 8  }
  0x12   :  { %43 = dma.hbm_to_vmem [thread:$0]  %s606_s6, 512, %s38_s18, [#allocation3], %s458_s27, %s458_s27, %s459_s28  }
  0x13   :  { %451 = dma.done.wait [#allocation3], 512  }
  0x14   :  { %452 = vsyncadd [#allocation3], 4294966784  ;;  %v460_v0 = vmov 0.0|0.0   ;;  %vm461_vm0 = vmmov 0   ;;  %v462_v1 = vmov 0.0   ;;  %v463_v2 = vmov 0  }
  0x15   :  { %355 = vmatprep.subr.bf16.mxu0 %v460_v0  ;;  %358 = vmatprep.subr.bf16.mxu1 %v460_v0  ;;  %v54_v3 = vld [vmem:[%s605_s5] sm:$0xff]  ;;  %v55_v4 = vld [vmem:[%s605_s5 + $0x8] sm:$0xff]  ;;  %v133_v8 = vld [vmem:[#allocation2 + $0x10] sm:$0xff]  ;;  %vm56_vm1 = vcmask 130048   ;;  %vm135_vm2 = vcmask 261120   ;;  %s465_s25 = smov 32  }
  0x16   :  { %341 = vmatprep.mubr.msk.f32.mxu0 %vm461_vm0, %v462_v1  ;;  %352 = vmatprep.mubr.msk.f32.mxu1 %vm461_vm0, %v462_v1  ;;  %v131_v5 = vld [vmem:[#allocation2] sm:$0xff]  ;;  %v356_v6 = vpack.c.bf16 %v55_v4, %v54_v3  ;;  %v132_v7 = vld [vmem:[#allocation2 + $0x8] sm:$0xff]  ;;  %v134_v10 = vld [vmem:[#allocation2 + $0x18] sm:$0xff]  ;;  %vm281_vm3 = vcmask 254976  }
  0x17   :  { %376 = vset.pattern.permute.xlu0 %v463_v2  ;;  %v359_v9 = vpack.c.bf16 %v132_v7, %v131_v5  ;;  %v209_v11 = vld [vmem:[%s602_s2] sm:$0x3]  ;;  %v362_v13 = vpack.c.bf16 %v134_v10, %v133_v8 }
  0x18   :  { %357 = vmatpush3.bf16.msra.mxu0 %v356_v6  ;;  %v53_v12 = vld [vmem:[%s600_s0] sm:$0x3]  ;;  %213 = vperm.xlu0 %376, %v209_v11  }
  0x19   :  { %360 = vmatpush3.bf16.msra.mxu1 %v359_v9  ;;  %v224_v14 = vld [vmem:[%s603_s3] sm:$0x3] }
  0x1a   :  { %361 = vmatprep.subr.bf16.mxu1 %v460_v0  ;;  %v130_v15 = vld [vmem:[%s601_s1] sm:$0x3] }
  0x1b   :  { %342 = vmatmul.mubr.msk.f32.vlgmr.msra.gmra.mrb[0].mxu0 %vm56_vm1, %v53_v12  ;;  %v325_v17 = vld [vmem:[%s607_s7] ss:$0 sm:$0xff]  ;;  %s464_s7 = smov 64  }
  0x1c   :  { %228 = vperm.xlu0 %376, %v224_v14   ;;  %v326_v19 = vld [vmem:[%s608_s8] ss:$0 sm:$0xff] }
  0x1d   :  { %363 = vmatpush3.bf16.msra.mxu1 %v362_v13  ;;  %v327_v34 = vld [vmem:[%s609_s9] ss:$0 sm:$0xff]  ;;  %s466_s9 = smov 96  }
  0x1e   :  { %v261_v38 = vld [vmem:[%s604_s4] sm:$0x3]  ;;  %s467_s4 = smov [#allocation6]  }
  0x1f   :  { %s310_s26 = sshll.u32 %s467_s4, 4  ;;  %s311_s26 = int_to_ptr.vmem [resolvable:$true] %s310_s26 }
  0x20   :  { %353 = vmatmul.mubr.msk.f32.vlgmr.msra.gmra.mrb[0].mxu1 %vm135_vm2, %v130_v15  ;;  %s407_s27 = scalar_lea.vmem %s311_s26, 32  ;;  %p412_p9 = scmp.lt.s32.totalorder %s311_s26, %s311_s26 }
  0x21   :  { %p408_p8 = scmp.ne.s32.totalorder %s311_s26, %s407_s27  ;;  %p413_p10 = scmp.lt.s32.totalorder %s407_s27, %s407_s27 }
  0x23   :  { %p414_p11 = por %p413_p10, %p412_p9 }
  0x25   :  { %p415_p12 = pnand %p414_p11, %p408_p8 }
  0x97   :  { %v214_v16 = vpop.permute.xlu0 %213 }
  0x98   :  { %v222_v18 = vmul.f32 %v325_v17, %v214_v16 }
  0x9a   :  { %v223_v21 = vmax.f32 %v222_v18, 1e-08 }
  0x9b   :  { %v229_v20 = vpop.permute.xlu0 %228 }
  0x9c   :  { %v237_v22 = vmul.f32 %v326_v19, %v229_v20  ;;  %v239_v25 = vsub.f32 0.0, %v223_v21 }
  0x9e   :  { %v238_v23 = vmax.f32 %v237_v22, 1e-08 }
  0xa0   :  { %v242_v28 = vsub.f32 0.0, %v238_v23 }
  0xee   :  { %v126_v24 = vpop.f32.mrb[0].mxu0 }
  0xef   :  { %v343_v26 = vpop.f32.mrb[1].mxu0  ;;  %v240_v27 = vmax.f32 %v239_v25, %v126_v24 }
  0xf1   :  { %v241_v32 = vmin.f32 %v223_v21, %v240_v27 }
  0xf3   :  { %v205_v29 = vpop.f32.mrb[0].mxu1 }
  0xf4   :  { %v243_v30 = vmax.f32 %v242_v28, %v205_v29  ;;  %v354_v31 = vpop.f32.mrb[1].mxu1 }
  0xf6   :  { %v244_v33 = vmin.f32 %v238_v23, %v243_v30 }
  0xf8   :  { %v245_v35 = vadd.f32 %v244_v33, %v241_v32 }
  0xfa   :  { %v253_v36 = vadd.f32 %v327_v34, %v245_v35 }
  0xfc   :  { %377 = vtanh.f32 %v253_v36  ;;  %v328_v39 = vmul.f32 -1.442695, %v253_v36 }
  0xfe   :  { %379 = vpow2.f32 %v328_v39 }
 0x106   :  { %v378_v37 = vpop.eup %377 }
 0x107   :  { %268 = vrot.lane.b32.xlu1 %v378_v37, %s464_s7 }
 0x108   :  { %v380_v40 = vpop.eup %379 }
 0x109   :  { %v257_v41 = vadd.f32 1.0, %v380_v40 }
 0x10b   :  { %263 = vrot.lane.b32.xlu1 %v261_v38, %s465_s25  ;;  %381 = vrcp.f32 %v257_v41 }
 0x115   :  { %v382_v42 = vpop.eup %381 }
 0x179   :  { %v269_v43 = vpop.permute.xlu1 %268 }
 0x17a   :  { %v271_v44 = vmul.f32 %v382_v42, %v269_v43 }
 0x17c   :  { %273 = vrot.lane.b32.xlu0 %v271_v44, %s465_s25 }
 0x17d   :  { %v264_v45 = vpop.permute.xlu1 %263 }
 0x17e   :  { %v266_v46 = vmul.f32 %v382_v42, %v264_v45 }
 0x1ee   :  { %v274_v47 = vpop.permute.xlu0 %273 }
 0x1ef   :  { %v276_v48 = vadd.f32 %v274_v47, %v266_v46 }
 0x1f1   :  { %383 = vtanh.f32 %v276_v48  ;;  %278 = vrot.lane.b32.xlu0 %v276_v48, %s466_s9 }
 0x1fb   :  { %v384_v49 = vpop.eup %383 }
 0x1fc   :  { %285 = vrot.lane.b32.xlu1 %v384_v49, %s464_s7 }
 0x263   :  { %v279_v50 = vpop.permute.xlu0 %278 }
 0x264   :  { %282 = vst.msk [vmem:[#allocation6] sm:$0x3] %vm281_vm3, %v279_v50 }
 0x265   :  { %418 = shalt.err (!%p415_p12)
}
 0x266   :  { %s419_s30 = scalar_lea.hbm %s611_s11, 32 }
 0x267   :  { %p420_p13 = scmp.ne.s32.totalorder %s611_s11, %s419_s30  ;;  %p423_p0 = scmp.lt.u32.totalorder %s419_s30, %s611_s11 }
 0x269   :  { %p425_p1 = pnand %p423_p0, %p420_p13 }
 0x26b   :  { %428 = shalt.err (!%p425_p1)
}
 0x26c   :  { %313 = dma.vmem_to_hbm [thread:$0]  %s311_s26, 32, %s611_s11, [#allocation7]  }
 0x26d   :  { %s468_s17 = smov [#allocation5]  }
 0x26e   :  { %v286_v51 = vpop.permute.xlu1 %285  ;;  %s300_s18 = sshll.u32 %s468_s17, 4  ;;  %s301_s18 = int_to_ptr.vmem [resolvable:$true] %s300_s18 }
 0x26f   :  { %v288_v52 = vmul.f32 %v382_v42, %v286_v51  ;;  %s429_s5 = scalar_lea.vmem %s301_s18, 32  ;;  %p434_p3 = scmp.lt.s32.totalorder %s301_s18, %s301_s18 }
 0x270   :  { %p430_p2 = scmp.ne.s32.totalorder %s301_s18, %s429_s5  ;;  %p435_p4 = scmp.lt.s32.totalorder %s429_s5, %s429_s5 }
 0x271   :  { %290 = vrot.lane.b32.xlu1 %v288_v52, %s465_s25 }
 0x272   :  { %p436_p5 = por %p435_p4, %p434_p3 }
 0x274   :  { %p437_p6 = pnand %p436_p5, %p430_p2 }
 0x2e3   :  { %v291_v53 = vpop.permute.xlu1 %290 }
 0x2e4   :  { %293 = vst.msk [vmem:[#allocation5] sm:$0x3] %vm281_vm3, %v291_v53 }
 0x2e5   :  { %440 = shalt.err (!%p437_p6)
}
 0x2e6   :  { %s441_s11 = scalar_lea.hbm %s610_s10, 32 }
 0x2e7   :  { %p442_p7 = scmp.ne.s32.totalorder %s610_s10, %s441_s11  ;;  %p445_p8 = scmp.lt.u32.totalorder %s441_s11, %s610_s10 }
 0x2e9   :  { %p447_p9 = pnand %p445_p8, %p442_p7 }
 0x2eb   :  { %450 = shalt.err (!%p447_p9)
}
 0x2ec   :  { %303 = dma.vmem_to_hbm [thread:$0]  %s301_s18, 32, %s610_s10, [#allocation4]  }
 0x2ed   :  { %453 = dma.done.wait [#allocation4], 32  }
 0x2ee   :  { %454 = vsyncadd [#allocation4], 4294967264 }
 0x2ef   :  { %455 = dma.done.wait [#allocation7], 32  }
 0x2f0   :  { %456 = vsyncadd [#allocation7], 4294967264 }
 0x2f1   :  { %320 = vsyncpa [#allocation3], 1 }
 0x2f2   :  { %321 = vsyncpa [#allocation4], 1 }
 0x2f3   :  { %322 = vsyncpa [#allocation7], 1 }

</bundles_post_ra>
